<compile_context>
chip_gen: v7x
topology: tpu7x:2x2x1
jax: 0.10.0
libtpu: 0.0.40
codegen_flags: <defaults>
</compile_context>

<pallas_src>
import functools

import jax
import jax.numpy as jnp
from jax.experimental import pallas as pl
from jax.experimental.pallas import tpu as pltpu


def _round_up(v, m):
    return ((v + m - 1) // m) * m


def _dilated_conv_block_kernel(w_ref, x_ref, o_ref, *, Bn, Cin, Cout, H, W, d):
    # w_ref: (9, Cout, Cin)   per-tap weights (resident across the grid)
    # x_ref: (Bn, Cin, L)     flat layout per sample:
    #                         [d zeros | (H+2d) rows of width W | zero tail]
    # o_ref: (Bn, Cout, H*W)  lane-dense output (H*W multiple of 128 here)
    HW = H * W
    inv_hw = 1.0 / HW

    # Column-within-row index of every output lane (hoisted out of all loops).
    col = jax.lax.broadcasted_iota(jnp.int32, (Cin, HW), 1) % W
    left_ok = col >= d          # valid positions for kj == 0 taps
    right_ok = col < (W - d)    # valid positions for kj == 2 taps

    for b in range(Bn):
        acc = jnp.zeros((Cout, HW), jnp.float32)
        for ki in range(3):
            for kj in range(3):
                # For output flat index q = h*W + w, tap (ki, kj) reads
                # flat[d + ki*d*W + (kj-1)*d + q]  (static, >= 0 by construction).
                start = d + ki * d * W + (kj - 1) * d
                tap = x_ref[b, :, pl.ds(start, HW)]            # (Cin, HW)
                # Horizontal border taps wrap to the neighboring row in the
                # flat layout -> mask them to the conv's zero padding.
                if kj == 0:
                    tap = jnp.where(left_ok, tap, jnp.zeros_like(tap))
                elif kj == 2:
                    tap = jnp.where(right_ok, tap, jnp.zeros_like(tap))
                w_t = w_ref[ki * 3 + kj]                       # (Cout, Cin)
                acc = acc + jnp.dot(w_t, tap,
                                    preferred_element_type=jnp.float32)

        # InstanceNorm2d(affine=False), eps=1e-5, biased variance,
        # centered two-pass form (f32 throughout).
        mean = jnp.sum(acc, axis=-1, keepdims=True) * inv_hw
        cent = acc - mean
        var = jnp.sum(cent * cent, axis=-1, keepdims=True) * inv_hw
        yn = cent * jax.lax.rsqrt(var + 1e-5)

        # LeakyReLU(0.2)
        o_ref[b] = jnp.where(yn > 0, yn, 0.2 * yn).astype(o_ref.dtype)


def dilated_conv_block(x_nchw, weight_oihw, bias, dilation, *,
                       block_batch=None, compute_dtype=None):
    """x_nchw: (N, Cin, H, W); weight_oihw: (Cout, Cin, 3, 3); bias: (Cout,)."""
    N, Cin, H, W = x_nchw.shape
    Cout = weight_oihw.shape[0]
    d = int(dilation)
    del bias  # cancelled exactly by InstanceNorm2d(affine=False) mean subtraction

    if compute_dtype is None:
        compute_dtype = x_nchw.dtype
    Bn = N if block_batch is None else int(block_batch)
    assert N % Bn == 0, "batch must be divisible by the batch block"
    HW = H * W

    # --- wrapper-side: pad H only, flatten rows, add d leading zeros and a
    #     zero tail so every in-kernel tap read is in-bounds and the lane dim
    #     is a multiple of 128.  This is ~1x the input bytes (no 9x slab). ---
    core = (H + 2 * d) * W
    L = _round_up(core + 2 * d, 128)
    x_padh = jnp.pad(x_nchw, ((0, 0), (0, 0), (d, d), (0, 0)))     # (N,Cin,H+2d,W)
    x_flat = jnp.pad(x_padh.reshape(N, Cin, core),
                     ((0, 0), (0, 0), (d, L - d - core)))          # (N,Cin,L)
    x_flat = x_flat.astype(compute_dtype)

    # weight OIHW -> (tap=ki*3+kj, Cout, Cin)
    w_taps = jnp.transpose(weight_oihw, (2, 3, 0, 1)).reshape(9, Cout, Cin)
    w_taps = w_taps.astype(compute_dtype)

    kernel = functools.partial(_dilated_conv_block_kernel,
                               Bn=Bn, Cin=Cin, Cout=Cout, H=H, W=W, d=d)

    out = pl.pallas_call(
        kernel,
        out_shape=jax.ShapeDtypeStruct((N, Cout, HW), x_nchw.dtype),
        grid_spec=pltpu.PrefetchScalarGridSpec(
            num_scalar_prefetch=0,
            grid=(N // Bn,),
            in_specs=[
                pl.BlockSpec((9, Cout, Cin), lambda nb: (0, 0, 0)),
                pl.BlockSpec((Bn, Cin, L), lambda nb: (nb, 0, 0)),
            ],
            out_specs=pl.BlockSpec((Bn, Cout, HW), lambda nb: (nb, 0, 0)),
        ),
        compiler_params=pltpu.CompilerParams(
            dimension_semantics=("parallel",)),
    )(w_taps, x_flat)

    return out.reshape(N, Cout, H, W)                              # metadata-only


def _reference(x_nchw, weight_oihw, bias, dilation):
    d = int(dilation)
    y = jax.lax.conv_general_dilated(
        x_nchw.astype(jnp.float32), weight_oihw.astype(jnp.float32),
        window_strides=(1, 1), padding=((d, d), (d, d)),
        rhs_dilation=(d, d),
        dimension_numbers=("NCHW", "OIHW", "NCHW"))
    y = y + bias.reshape(1, -1, 1, 1)
    mean = jnp.mean(y, axis=(2, 3), keepdims=True)
    var = jnp.mean((y - mean) ** 2, axis=(2, 3), keepdims=True)
    y = (y - mean) * jax.lax.rsqrt(var + 1e-5)
    return jnp.where(y > 0, y, 0.2 * y)


if __name__ == "__main__":
    key = jax.random.PRNGKey(0)
    kx, kw, kb = jax.random.split(key, 3)

    # Small shapes consistent with the module: batch=2, in=4, out=8, 16x16, dilation=2
    N, Cin, Cout, H, W, d = 2, 4, 8, 16, 16, 2

    x = jax.random.normal(kx, (N, Cin, H, W), dtype=jnp.float32)
    weight = jax.random.normal(kw, (Cout, Cin, 3, 3), dtype=jnp.float32) * 0.1
    bias = jax.random.normal(kb, (Cout,), dtype=jnp.float32) * 0.1

    ref = _reference(x, weight, bias, d)

    # f32 path (default, exact module semantics).
    out = jax.block_until_ready(dilated_conv_block(x, weight, bias, d))
    assert out.shape == (N, Cout, H, W)
    assert jnp.allclose(out, ref, atol=1e-4, rtol=1e-4), \
        float(jnp.max(jnp.abs(out - ref)))

    # bf16-streaming path (perf-review item 3): halves streamed bytes; norm math stays f32.
    out_bf16 = jax.block_until_ready(
        dilated_conv_block(x, weight, bias, d, compute_dtype=jnp.bfloat16))
    assert jnp.allclose(out_bf16, ref, atol=5e-2, rtol=5e-2), \
        float(jnp.max(jnp.abs(out_bf16 - ref)))

    print("KERNEL_OK")
</pallas_src>

<mosaic_0001>
module attributes {stable_mosaic.version = 11 : i64} {
  func.func @_dilated_conv_block_kernel(%arg0: i32, %arg1: memref<9x8x4xf32, #tpu.memory_space<vmem>>, %arg2: memref<2x4x384xf32, #tpu.memory_space<vmem>>, %arg3: memref<2x8x256xf32, #tpu.memory_space<vmem>>) attributes {dimension_semantics = [#tpu.dimension_semantics<parallel>], iteration_bounds = array<i64: 1>, scalar_prefetch = 0 : i64, scratch_operands = 0 : i64, tpu.core_type = #tpu.core_type<tc>, window_params = [{pipeline_mode = #tpu.pipeline_mode<synchronous>, transform_indices = @transform_0, window_bounds = array<i64: 9, 8, 4>}, {transform_indices = @transform_1, window_bounds = array<i64: 2, 4, 384>}, {transform_indices = @transform_2, window_bounds = array<i64: 2, 8, 256>}]} {
    %0 = tpu.iota {dimensions = array<i32: 1>} : vector<4x256xi32>
    %c16_i32 = arith.constant 16 : i32
    %c0_i32 = arith.constant 0 : i32
    %1 = arith.cmpi eq, %c16_i32, %c0_i32 : i32
    %c1_i32 = arith.constant 1 : i32
    %2 = arith.select %1, %c1_i32, %c16_i32 : i32
    %3 = vector.broadcast %2 : i32 to vector<4x256xi32>
    %4 = arith.remsi %0, %3 : vector<4x256xi32>
    %c0_i32_0 = arith.constant 0 : i32
    %5 = vector.broadcast %c0_i32_0 : i32 to vector<4x256xi32>
    %6 = arith.cmpi ne, %4, %5 : vector<4x256xi32>
    %c0_i32_1 = arith.constant 0 : i32
    %7 = vector.broadcast %c0_i32_1 : i32 to vector<4x256xi32>
    %8 = arith.cmpi slt, %4, %7 : vector<4x256xi32>
    %c0_i32_2 = arith.constant 0 : i32
    %9 = arith.cmpi slt, %2, %c0_i32_2 : i32
    %10 = vector.broadcast %9 : i1 to vector<4x256xi1>
    %11 = vector.broadcast %10 : vector<4x256xi1> to vector<4x256xi1>
    %12 = arith.xori %8, %11 : vector<4x256xi1>
    %13 = arith.andi %12, %6 : vector<4x256xi1>
    %14 = vector.broadcast %2 : i32 to vector<4x256xi32>
    %15 = arith.addi %4, %14 : vector<4x256xi32>
    %16 = arith.select %13, %15, %4 : vector<4x256xi1>, vector<4x256xi32>
    %c2_i32 = arith.constant 2 : i32
    %17 = vector.broadcast %c2_i32 : i32 to vector<4x256xi32>
    %18 = arith.cmpi sge, %16, %17 : vector<4x256xi32>
    %c14_i32 = arith.constant 14 : i32
    %19 = vector.broadcast %c14_i32 : i32 to vector<4x256xi32>
    %20 = arith.cmpi slt, %16, %19 : vector<4x256xi32>
    %cst = arith.constant 0.000000e+00 : f32
    %21 = vector.broadcast %cst : f32 to vector<8x256xf32>
    %c0 = arith.constant 0 : index
    %c0_3 = arith.constant 0 : index
    %c0_4 = arith.constant 0 : index
    %22 = vector.load %arg2[%c0, %c0_3, %c0_4] : memref<2x4x384xf32, #tpu.memory_space<vmem>>, vector<1x4x256xf32>
    %23 = vector.shape_cast %22 : vector<1x4x256xf32> to vector<4x256xf32>
    %cst_5 = arith.constant 0.000000e+00 : f32
    %24 = vector.broadcast %cst_5 : f32 to vector<4x256xf32>
    %25 = arith.select %18, %23, %24 : vector<4x256xi1>, vector<4x256xf32>
    %c0_6 = arith.constant 0 : index
    %c0_7 = arith.constant 0 : index
    %c0_8 = arith.constant 0 : index
    %26 = vector.load %arg1[%c0_6, %c0_7, %c0_8] : memref<9x8x4xf32, #tpu.memory_space<vmem>>, vector<1x8x4xf32>
    %27 = vector.shape_cast %26 : vector<1x8x4xf32> to vector<8x4xf32>
    %cst_9 = arith.constant dense<0.000000e+00> : vector<8x256xf32>
    %28 = tpu.matmul %27, %25, %cst_9 {dimension_numbers = #tpu.dot_dimension_numbers<[1], [0], [0], [1], [0, 0, 1, 1], [], []>} : vector<8x4xf32>, vector<4x256xf32>, vector<8x256xf32> -> vector<8x256xf32>
    %29 = arith.addf %21, %28 : vector<8x256xf32>
    %c0_10 = arith.constant 0 : index
    %c0_11 = arith.constant 0 : index
    %c2 = arith.constant 2 : index
    %30 = vector.load %arg2[%c0_10, %c0_11, %c2] : memref<2x4x384xf32, #tpu.memory_space<vmem>>, vector<1x4x256xf32>
    %31 = vector.shape_cast %30 : vector<1x4x256xf32> to vector<4x256xf32>
    %c1 = arith.constant 1 : index
    %c0_12 = arith.constant 0 : index
    %c0_13 = arith.constant 0 : index
    %32 = vector.load %arg1[%c1, %c0_12, %c0_13] : memref<9x8x4xf32, #tpu.memory_space<vmem>>, vector<1x8x4xf32>
    %33 = vector.shape_cast %32 : vector<1x8x4xf32> to vector<8x4xf32>
    %cst_14 = arith.constant dense<0.000000e+00> : vector<8x256xf32>
    %34 = tpu.matmul %33, %31, %cst_14 {dimension_numbers = #tpu.dot_dimension_numbers<[1], [0], [0], [1], [0, 0, 1, 1], [], []>} : vector<8x4xf32>, vector<4x256xf32>, vector<8x256xf32> -> vector<8x256xf32>
    %35 = arith.addf %29, %34 : vector<8x256xf32>
    %c0_15 = arith.constant 0 : index
    %c0_16 = arith.constant 0 : index
    %c4 = arith.constant 4 : index
    %36 = vector.load %arg2[%c0_15, %c0_16, %c4] : memref<2x4x384xf32, #tpu.memory_space<vmem>>, vector<1x4x256xf32>
    %37 = vector.shape_cast %36 : vector<1x4x256xf32> to vector<4x256xf32>
    %cst_17 = arith.constant 0.000000e+00 : f32
    %38 = vector.broadcast %cst_17 : f32 to vector<4x256xf32>
    %39 = arith.select %20, %37, %38 : vector<4x256xi1>, vector<4x256xf32>
    %c2_18 = arith.constant 2 : index
    %c0_19 = arith.constant 0 : index
    %c0_20 = arith.constant 0 : index
    %40 = vector.load %arg1[%c2_18, %c0_19, %c0_20] : memref<9x8x4xf32, #tpu.memory_space<vmem>>, vector<1x8x4xf32>
    %41 = vector.shape_cast %40 : vector<1x8x4xf32> to vector<8x4xf32>
    %cst_21 = arith.constant dense<0.000000e+00> : vector<8x256xf32>
    %42 = tpu.matmul %41, %39, %cst_21 {dimension_numbers = #tpu.dot_dimension_numbers<[1], [0], [0], [1], [0, 0, 1, 1], [], []>} : vector<8x4xf32>, vector<4x256xf32>, vector<8x256xf32> -> vector<8x256xf32>
    %43 = arith.addf %35, %42 : vector<8x256xf32>
    %c0_22 = arith.constant 0 : index
    %c0_23 = arith.constant 0 : index
    %c32 = arith.constant 32 : index
    %44 = vector.load %arg2[%c0_22, %c0_23, %c32] : memref<2x4x384xf32, #tpu.memory_space<vmem>>, vector<1x4x256xf32>
    %45 = vector.shape_cast %44 : vector<1x4x256xf32> to vector<4x256xf32>
    %cst_24 = arith.constant 0.000000e+00 : f32
    %46 = vector.broadcast %cst_24 : f32 to vector<4x256xf32>
    %47 = arith.select %18, %45, %46 : vector<4x256xi1>, vector<4x256xf32>
    %c3 = arith.constant 3 : index
    %c0_25 = arith.constant 0 : index
    %c0_26 = arith.constant 0 : index
    %48 = vector.load %arg1[%c3, %c0_25, %c0_26] : memref<9x8x4xf32, #tpu.memory_space<vmem>>, vector<1x8x4xf32>
    %49 = vector.shape_cast %48 : vector<1x8x4xf32> to vector<8x4xf32>
    %cst_27 = arith.constant dense<0.000000e+00> : vector<8x256xf32>
    %50 = tpu.matmul %49, %47, %cst_27 {dimension_numbers = #tpu.dot_dimension_numbers<[1], [0], [0], [1], [0, 0, 1, 1], [], []>} : vector<8x4xf32>, vector<4x256xf32>, vector<8x256xf32> -> vector<8x256xf32>
    %51 = arith.addf %43, %50 : vector<8x256xf32>
    %c0_28 = arith.constant 0 : index
    %c0_29 = arith.constant 0 : index
    %c34 = arith.constant 34 : index
    %52 = vector.load %arg2[%c0_28, %c0_29, %c34] : memref<2x4x384xf32, #tpu.memory_space<vmem>>, vector<1x4x256xf32>
    %53 = vector.shape_cast %52 : vector<1x4x256xf32> to vector<4x256xf32>
    %c4_30 = arith.constant 4 : index
    %c0_31 = arith.constant 0 : index
    %c0_32 = arith.constant 0 : index
    %54 = vector.load %arg1[%c4_30, %c0_31, %c0_32] : memref<9x8x4xf32, #tpu.memory_space<vmem>>, vector<1x8x4xf32>
    %55 = vector.shape_cast %54 : vector<1x8x4xf32> to vector<8x4xf32>
    %cst_33 = arith.constant dense<0.000000e+00> : vector<8x256xf32>
    %56 = tpu.matmul %55, %53, %cst_33 {dimension_numbers = #tpu.dot_dimension_numbers<[1], [0], [0], [1], [0, 0, 1, 1], [], []>} : vector<8x4xf32>, vector<4x256xf32>, vector<8x256xf32> -> vector<8x256xf32>
    %57 = arith.addf %51, %56 : vector<8x256xf32>
    %c0_34 = arith.constant 0 : index
    %c0_35 = arith.constant 0 : index
    %c36 = arith.constant 36 : index
    %58 = vector.load %arg2[%c0_34, %c0_35, %c36] : memref<2x4x384xf32, #tpu.memory_space<vmem>>, vector<1x4x256xf32>
    %59 = vector.shape_cast %58 : vector<1x4x256xf32> to vector<4x256xf32>
    %cst_36 = arith.constant 0.000000e+00 : f32
    %60 = vector.broadcast %cst_36 : f32 to vector<4x256xf32>
    %61 = arith.select %20, %59, %60 : vector<4x256xi1>, vector<4x256xf32>
    %c5 = arith.constant 5 : index
    %c0_37 = arith.constant 0 : index
    %c0_38 = arith.constant 0 : index
    %62 = vector.load %arg1[%c5, %c0_37, %c0_38] : memref<9x8x4xf32, #tpu.memory_space<vmem>>, vector<1x8x4xf32>
    %63 = vector.shape_cast %62 : vector<1x8x4xf32> to vector<8x4xf32>
    %cst_39 = arith.constant dense<0.000000e+00> : vector<8x256xf32>
    %64 = tpu.matmul %63, %61, %cst_39 {dimension_numbers = #tpu.dot_dimension_numbers<[1], [0], [0], [1], [0, 0, 1, 1], [], []>} : vector<8x4xf32>, vector<4x256xf32>, vector<8x256xf32> -> vector<8x256xf32>
    %65 = arith.addf %57, %64 : vector<8x256xf32>
    %c0_40 = arith.constant 0 : index
    %c0_41 = arith.constant 0 : index
    %c64 = arith.constant 64 : index
    %66 = vector.load %arg2[%c0_40, %c0_41, %c64] : memref<2x4x384xf32, #tpu.memory_space<vmem>>, vector<1x4x256xf32>
    %67 = vector.shape_cast %66 : vector<1x4x256xf32> to vector<4x256xf32>
    %cst_42 = arith.constant 0.000000e+00 : f32
    %68 = vector.broadcast %cst_42 : f32 to vector<4x256xf32>
    %69 = arith.select %18, %67, %68 : vector<4x256xi1>, vector<4x256xf32>
    %c6 = arith.constant 6 : index
    %c0_43 = arith.constant 0 : index
    %c0_44 = arith.constant 0 : index
    %70 = vector.load %arg1[%c6, %c0_43, %c0_44] : memref<9x8x4xf32, #tpu.memory_space<vmem>>, vector<1x8x4xf32>
    %71 = vector.shape_cast %70 : vector<1x8x4xf32> to vector<8x4xf32>
    %cst_45 = arith.constant dense<0.000000e+00> : vector<8x256xf32>
    %72 = tpu.matmul %71, %69, %cst_45 {dimension_numbers = #tpu.dot_dimension_numbers<[1], [0], [0], [1], [0, 0, 1, 1], [], []>} : vector<8x4xf32>, vector<4x256xf32>, vector<8x256xf32> -> vector<8x256xf32>
    %73 = arith.addf %65, %72 : vector<8x256xf32>
    %c0_46 = arith.constant 0 : index
    %c0_47 = arith.constant 0 : index
    %c66 = arith.constant 66 : index
    %74 = vector.load %arg2[%c0_46, %c0_47, %c66] : memref<2x4x384xf32, #tpu.memory_space<vmem>>, vector<1x4x256xf32>
    %75 = vector.shape_cast %74 : vector<1x4x256xf32> to vector<4x256xf32>
    %c7 = arith.constant 7 : index
    %c0_48 = arith.constant 0 : index
    %c0_49 = arith.constant 0 : index
    %76 = vector.load %arg1[%c7, %c0_48, %c0_49] : memref<9x8x4xf32, #tpu.memory_space<vmem>>, vector<1x8x4xf32>
    %77 = vector.shape_cast %76 : vector<1x8x4xf32> to vector<8x4xf32>
    %cst_50 = arith.constant dense<0.000000e+00> : vector<8x256xf32>
    %78 = tpu.matmul %77, %75, %cst_50 {dimension_numbers = #tpu.dot_dimension_numbers<[1], [0], [0], [1], [0, 0, 1, 1], [], []>} : vector<8x4xf32>, vector<4x256xf32>, vector<8x256xf32> -> vector<8x256xf32>
    %79 = arith.addf %73, %78 : vector<8x256xf32>
    %c0_51 = arith.constant 0 : index
    %c0_52 = arith.constant 0 : index
    %c68 = arith.constant 68 : index
    %80 = vector.load %arg2[%c0_51, %c0_52, %c68] : memref<2x4x384xf32, #tpu.memory_space<vmem>>, vector<1x4x256xf32>
    %81 = vector.shape_cast %80 : vector<1x4x256xf32> to vector<4x256xf32>
    %cst_53 = arith.constant 0.000000e+00 : f32
    %82 = vector.broadcast %cst_53 : f32 to vector<4x256xf32>
    %83 = arith.select %20, %81, %82 : vector<4x256xi1>, vector<4x256xf32>
    %c8 = arith.constant 8 : index
    %c0_54 = arith.constant 0 : index
    %c0_55 = arith.constant 0 : index
    %84 = vector.load %arg1[%c8, %c0_54, %c0_55] : memref<9x8x4xf32, #tpu.memory_space<vmem>>, vector<1x8x4xf32>
    %85 = vector.shape_cast %84 : vector<1x8x4xf32> to vector<8x4xf32>
    %cst_56 = arith.constant dense<0.000000e+00> : vector<8x256xf32>
    %86 = tpu.matmul %85, %83, %cst_56 {dimension_numbers = #tpu.dot_dimension_numbers<[1], [0], [0], [1], [0, 0, 1, 1], [], []>} : vector<8x4xf32>, vector<4x256xf32>, vector<8x256xf32> -> vector<8x256xf32>
    %87 = arith.addf %79, %86 : vector<8x256xf32>
    %cst_57 = arith.constant dense<0.000000e+00> : vector<8xf32>
    %88 = vector.multi_reduction <add>, %87, %cst_57 [1] : vector<8x256xf32> to vector<8xf32>
    %89 = vector.shape_cast %88 : vector<8xf32> to vector<8x1xf32>
    %cst_58 = arith.constant 3.906250e-03 : f32
    %90 = vector.broadcast %cst_58 : f32 to vector<8x1xf32>
    %91 = arith.mulf %89, %90 : vector<8x1xf32>
    %92 = vector.broadcast %91 : vector<8x1xf32> to vector<8x256xf32>
    %93 = arith.subf %87, %92 : vector<8x256xf32>
    %94 = arith.mulf %93, %93 : vector<8x256xf32>
    %cst_59 = arith.constant dense<0.000000e+00> : vector<8xf32>
    %95 = vector.multi_reduction <add>, %94, %cst_59 [1] : vector<8x256xf32> to vector<8xf32>
    %96 = vector.shape_cast %95 : vector<8xf32> to vector<8x1xf32>
    %cst_60 = arith.constant 3.906250e-03 : f32
    %97 = vector.broadcast %cst_60 : f32 to vector<8x1xf32>
    %98 = arith.mulf %96, %97 : vector<8x1xf32>
    %cst_61 = arith.constant 9.99999974E-6 : f32
    %99 = vector.broadcast %cst_61 : f32 to vector<8x1xf32>
    %100 = arith.addf %98, %99 : vector<8x1xf32>
    %101 = math.rsqrt %100 : vector<8x1xf32>
    %102 = vector.broadcast %101 : vector<8x1xf32> to vector<8x256xf32>
    %103 = arith.mulf %93, %102 : vector<8x256xf32>
    %cst_62 = arith.constant 0.000000e+00 : f32
    %104 = vector.broadcast %cst_62 : f32 to vector<8x256xf32>
    %105 = arith.cmpf ogt, %103, %104 : vector<8x256xf32>
    %cst_63 = arith.constant 2.000000e-01 : f32
    %106 = vector.broadcast %cst_63 : f32 to vector<8x256xf32>
    %107 = arith.mulf %106, %103 : vector<8x256xf32>
    %108 = arith.select %105, %103, %107 : vector<8x256xi1>, vector<8x256xf32>
    %c0_64 = arith.constant 0 : index
    %c0_65 = arith.constant 0 : index
    %c0_66 = arith.constant 0 : index
    %109 = vector.load %arg3[%c0_64, %c0_65, %c0_66] : memref<2x8x256xf32, #tpu.memory_space<vmem>>, vector<1x8x256xf32>
    %110 = vector.shape_cast %109 : vector<1x8x256xf32> to vector<8x256xf32>
    %111 = vector.shape_cast %108 : vector<8x256xf32> to vector<1x8x256xf32>
    tpu.vector_store %arg3[%c0_64, %c0_65, %c0_66], %111 {strides = array<i32>} : memref<2x8x256xf32, #tpu.memory_space<vmem>>, vector<1x8x256xf32>,
    %cst_67 = arith.constant 0.000000e+00 : f32
    %112 = vector.broadcast %cst_67 : f32 to vector<8x256xf32>
    %c1_68 = arith.constant 1 : index
    %c0_69 = arith.constant 0 : index
    %c0_70 = arith.constant 0 : index
    %113 = vector.load %arg2[%c1_68, %c0_69, %c0_70] : memref<2x4x384xf32, #tpu.memory_space<vmem>>, vector<1x4x256xf32>
    %114 = vector.shape_cast %113 : vector<1x4x256xf32> to vector<4x256xf32>
    %cst_71 = arith.constant 0.000000e+00 : f32
    %115 = vector.broadcast %cst_71 : f32 to vector<4x256xf32>
    %116 = arith.select %18, %114, %115 : vector<4x256xi1>, vector<4x256xf32>
    %c0_72 = arith.constant 0 : index
    %c0_73 = arith.constant 0 : index
    %c0_74 = arith.constant 0 : index
    %117 = vector.load %arg1[%c0_72, %c0_73, %c0_74] : memref<9x8x4xf32, #tpu.memory_space<vmem>>, vector<1x8x4xf32>
    %118 = vector.shape_cast %117 : vector<1x8x4xf32> to vector<8x4xf32>
    %cst_75 = arith.constant dense<0.000000e+00> : vector<8x256xf32>
    %119 = tpu.matmul %118, %116, %cst_75 {dimension_numbers = #tpu.dot_dimension_numbers<[1], [0], [0], [1], [0, 0, 1, 1], [], []>} : vector<8x4xf32>, vector<4x256xf32>, vector<8x256xf32> -> vector<8x256xf32>
    %120 = arith.addf %112, %119 : vector<8x256xf32>
    %c1_76 = arith.constant 1 : index
    %c0_77 = arith.constant 0 : index
    %c2_78 = arith.constant 2 : index
    %121 = vector.load %arg2[%c1_76, %c0_77, %c2_78] : memref<2x4x384xf32, #tpu.memory_space<vmem>>, vector<1x4x256xf32>
    %122 = vector.shape_cast %121 : vector<1x4x256xf32> to vector<4x256xf32>
    %c1_79 = arith.constant 1 : index
    %c0_80 = arith.constant 0 : index
    %c0_81 = arith.constant 0 : index
    %123 = vector.load %arg1[%c1_79, %c0_80, %c0_81] : memref<9x8x4xf32, #tpu.memory_space<vmem>>, vector<1x8x4xf32>
    %124 = vector.shape_cast %123 : vector<1x8x4xf32> to vector<8x4xf32>
    %cst_82 = arith.constant dense<0.000000e+00> : vector<8x256xf32>
    %125 = tpu.matmul %124, %122, %cst_82 {dimension_numbers = #tpu.dot_dimension_numbers<[1], [0], [0], [1], [0, 0, 1, 1], [], []>} : vector<8x4xf32>, vector<4x256xf32>, vector<8x256xf32> -> vector<8x256xf32>
    %126 = arith.addf %120, %125 : vector<8x256xf32>
    %c1_83 = arith.constant 1 : index
    %c0_84 = arith.constant 0 : index
    %c4_85 = arith.constant 4 : index
    %127 = vector.load %arg2[%c1_83, %c0_84, %c4_85] : memref<2x4x384xf32, #tpu.memory_space<vmem>>, vector<1x4x256xf32>
    %128 = vector.shape_cast %127 : vector<1x4x256xf32> to vector<4x256xf32>
    %cst_86 = arith.constant 0.000000e+00 : f32
    %129 = vector.broadcast %cst_86 : f32 to vector<4x256xf32>
    %130 = arith.select %20, %128, %129 : vector<4x256xi1>, vector<4x256xf32>
    %c2_87 = arith.constant 2 : index
    %c0_88 = arith.constant 0 : index
    %c0_89 = arith.constant 0 : index
    %131 = vector.load %arg1[%c2_87, %c0_88, %c0_89] : memref<9x8x4xf32, #tpu.memory_space<vmem>>, vector<1x8x4xf32>
    %132 = vector.shape_cast %131 : vector<1x8x4xf32> to vector<8x4xf32>
    %cst_90 = arith.constant dense<0.000000e+00> : vector<8x256xf32>
    %133 = tpu.matmul %132, %130, %cst_90 {dimension_numbers = #tpu.dot_dimension_numbers<[1], [0], [0], [1], [0, 0, 1, 1], [], []>} : vector<8x4xf32>, vector<4x256xf32>, vector<8x256xf32> -> vector<8x256xf32>
    %134 = arith.addf %126, %133 : vector<8x256xf32>
    %c1_91 = arith.constant 1 : index
    %c0_92 = arith.constant 0 : index
    %c32_93 = arith.constant 32 : index
    %135 = vector.load %arg2[%c1_91, %c0_92, %c32_93] : memref<2x4x384xf32, #tpu.memory_space<vmem>>, vector<1x4x256xf32>
    %136 = vector.shape_cast %135 : vector<1x4x256xf32> to vector<4x256xf32>
    %cst_94 = arith.constant 0.000000e+00 : f32
    %137 = vector.broadcast %cst_94 : f32 to vector<4x256xf32>
    %138 = arith.select %18, %136, %137 : vector<4x256xi1>, vector<4x256xf32>
    %c3_95 = arith.constant 3 : index
    %c0_96 = arith.constant 0 : index
    %c0_97 = arith.constant 0 : index
    %139 = vector.load %arg1[%c3_95, %c0_96, %c0_97] : memref<9x8x4xf32, #tpu.memory_space<vmem>>, vector<1x8x4xf32>
    %140 = vector.shape_cast %139 : vector<1x8x4xf32> to vector<8x4xf32>
    %cst_98 = arith.constant dense<0.000000e+00> : vector<8x256xf32>
    %141 = tpu.matmul %140, %138, %cst_98 {dimension_numbers = #tpu.dot_dimension_numbers<[1], [0], [0], [1], [0, 0, 1, 1], [], []>} : vector<8x4xf32>, vector<4x256xf32>, vector<8x256xf32> -> vector<8x256xf32>
    %142 = arith.addf %134, %141 : vector<8x256xf32>
    %c1_99 = arith.constant 1 : index
    %c0_100 = arith.constant 0 : index
    %c34_101 = arith.constant 34 : index
    %143 = vector.load %arg2[%c1_99, %c0_100, %c34_101] : memref<2x4x384xf32, #tpu.memory_space<vmem>>, vector<1x4x256xf32>
    %144 = vector.shape_cast %143 : vector<1x4x256xf32> to vector<4x256xf32>
    %c4_102 = arith.constant 4 : index
    %c0_103 = arith.constant 0 : index
    %c0_104 = arith.constant 0 : index
    %145 = vector.load %arg1[%c4_102, %c0_103, %c0_104] : memref<9x8x4xf32, #tpu.memory_space<vmem>>, vector<1x8x4xf32>
    %146 = vector.shape_cast %145 : vector<1x8x4xf32> to vector<8x4xf32>
    %cst_105 = arith.constant dense<0.000000e+00> : vector<8x256xf32>
    %147 = tpu.matmul %146, %144, %cst_105 {dimension_numbers = #tpu.dot_dimension_numbers<[1], [0], [0], [1], [0, 0, 1, 1], [], []>} : vector<8x4xf32>, vector<4x256xf32>, vector<8x256xf32> -> vector<8x256xf32>
    %148 = arith.addf %142, %147 : vector<8x256xf32>
    %c1_106 = arith.constant 1 : index
    %c0_107 = arith.constant 0 : index
    %c36_108 = arith.constant 36 : index
    %149 = vector.load %arg2[%c1_106, %c0_107, %c36_108] : memref<2x4x384xf32, #tpu.memory_space<vmem>>, vector<1x4x256xf32>
    %150 = vector.shape_cast %149 : vector<1x4x256xf32> to vector<4x256xf32>
    %cst_109 = arith.constant 0.000000e+00 : f32
    %151 = vector.broadcast %cst_109 : f32 to vector<4x256xf32>
    %152 = arith.select %20, %150, %151 : vector<4x256xi1>, vector<4x256xf32>
    %c5_110 = arith.constant 5 : index
    %c0_111 = arith.constant 0 : index
    %c0_112 = arith.constant 0 : index
    %153 = vector.load %arg1[%c5_110, %c0_111, %c0_112] : memref<9x8x4xf32, #tpu.memory_space<vmem>>, vector<1x8x4xf32>
    %154 = vector.shape_cast %153 : vector<1x8x4xf32> to vector<8x4xf32>
    %cst_113 = arith.constant dense<0.000000e+00> : vector<8x256xf32>
    %155 = tpu.matmul %154, %152, %cst_113 {dimension_numbers = #tpu.dot_dimension_numbers<[1], [0], [0], [1], [0, 0, 1, 1], [], []>} : vector<8x4xf32>, vector<4x256xf32>, vector<8x256xf32> -> vector<8x256xf32>
    %156 = arith.addf %148, %155 : vector<8x256xf32>
    %c1_114 = arith.constant 1 : index
    %c0_115 = arith.constant 0 : index
    %c64_116 = arith.constant 64 : index
    %157 = vector.load %arg2[%c1_114, %c0_115, %c64_116] : memref<2x4x384xf32, #tpu.memory_space<vmem>>, vector<1x4x256xf32>
    %158 = vector.shape_cast %157 : vector<1x4x256xf32> to vector<4x256xf32>
    %cst_117 = arith.constant 0.000000e+00 : f32
    %159 = vector.broadcast %cst_117 : f32 to vector<4x256xf32>
    %160 = arith.select %18, %158, %159 : vector<4x256xi1>, vector<4x256xf32>
    %c6_118 = arith.constant 6 : index
    %c0_119 = arith.constant 0 : index
    %c0_120 = arith.constant 0 : index
    %161 = vector.load %arg1[%c6_118, %c0_119, %c0_120] : memref<9x8x4xf32, #tpu.memory_space<vmem>>, vector<1x8x4xf32>
    %162 = vector.shape_cast %161 : vector<1x8x4xf32> to vector<8x4xf32>
    %cst_121 = arith.constant dense<0.000000e+00> : vector<8x256xf32>
    %163 = tpu.matmul %162, %160, %cst_121 {dimension_numbers = #tpu.dot_dimension_numbers<[1], [0], [0], [1], [0, 0, 1, 1], [], []>} : vector<8x4xf32>, vector<4x256xf32>, vector<8x256xf32> -> vector<8x256xf32>
    %164 = arith.addf %156, %163 : vector<8x256xf32>
    %c1_122 = arith.constant 1 : index
    %c0_123 = arith.constant 0 : index
    %c66_124 = arith.constant 66 : index
    %165 = vector.load %arg2[%c1_122, %c0_123, %c66_124] : memref<2x4x384xf32, #tpu.memory_space<vmem>>, vector<1x4x256xf32>
    %166 = vector.shape_cast %165 : vector<1x4x256xf32> to vector<4x256xf32>
    %c7_125 = arith.constant 7 : index
    %c0_126 = arith.constant 0 : index
    %c0_127 = arith.constant 0 : index
    %167 = vector.load %arg1[%c7_125, %c0_126, %c0_127] : memref<9x8x4xf32, #tpu.memory_space<vmem>>, vector<1x8x4xf32>
    %168 = vector.shape_cast %167 : vector<1x8x4xf32> to vector<8x4xf32>
    %cst_128 = arith.constant dense<0.000000e+00> : vector<8x256xf32>
    %169 = tpu.matmul %168, %166, %cst_128 {dimension_numbers = #tpu.dot_dimension_numbers<[1], [0], [0], [1], [0, 0, 1, 1], [], []>} : vector<8x4xf32>, vector<4x256xf32>, vector<8x256xf32> -> vector<8x256xf32>
    %170 = arith.addf %164, %169 : vector<8x256xf32>
    %c1_129 = arith.constant 1 : index
    %c0_130 = arith.constant 0 : index
    %c68_131 = arith.constant 68 : index
    %171 = vector.load %arg2[%c1_129, %c0_130, %c68_131] : memref<2x4x384xf32, #tpu.memory_space<vmem>>, vector<1x4x256xf32>
    %172 = vector.shape_cast %171 : vector<1x4x256xf32> to vector<4x256xf32>
    %cst_132 = arith.constant 0.000000e+00 : f32
    %173 = vector.broadcast %cst_132 : f32 to vector<4x256xf32>
    %174 = arith.select %20, %172, %173 : vector<4x256xi1>, vector<4x256xf32>
    %c8_133 = arith.constant 8 : index
    %c0_134 = arith.constant 0 : index
    %c0_135 = arith.constant 0 : index
    %175 = vector.load %arg1[%c8_133, %c0_134, %c0_135] : memref<9x8x4xf32, #tpu.memory_space<vmem>>, vector<1x8x4xf32>
    %176 = vector.shape_cast %175 : vector<1x8x4xf32> to vector<8x4xf32>
    %cst_136 = arith.constant dense<0.000000e+00> : vector<8x256xf32>
    %177 = tpu.matmul %176, %174, %cst_136 {dimension_numbers = #tpu.dot_dimension_numbers<[1], [0], [0], [1], [0, 0, 1, 1], [], []>} : vector<8x4xf32>, vector<4x256xf32>, vector<8x256xf32> -> vector<8x256xf32>
    %178 = arith.addf %170, %177 : vector<8x256xf32>
    %cst_137 = arith.constant dense<0.000000e+00> : vector<8xf32>
    %179 = vector.multi_reduction <add>, %178, %cst_137 [1] : vector<8x256xf32> to vector<8xf32>
    %180 = vector.shape_cast %179 : vector<8xf32> to vector<8x1xf32>
    %cst_138 = arith.constant 3.906250e-03 : f32
    %181 = vector.broadcast %cst_138 : f32 to vector<8x1xf32>
    %182 = arith.mulf %180, %181 : vector<8x1xf32>
    %183 = vector.broadcast %182 : vector<8x1xf32> to vector<8x256xf32>
    %184 = arith.subf %178, %183 : vector<8x256xf32>
    %185 = arith.mulf %184, %184 : vector<8x256xf32>
    %cst_139 = arith.constant dense<0.000000e+00> : vector<8xf32>
    %186 = vector.multi_reduction <add>, %185, %cst_139 [1] : vector<8x256xf32> to vector<8xf32>
    %187 = vector.shape_cast %186 : vector<8xf32> to vector<8x1xf32>
    %cst_140 = arith.constant 3.906250e-03 : f32
    %188 = vector.broadcast %cst_140 : f32 to vector<8x1xf32>
    %189 = arith.mulf %187, %188 : vector<8x1xf32>
    %cst_141 = arith.constant 9.99999974E-6 : f32
    %190 = vector.broadcast %cst_141 : f32 to vector<8x1xf32>
    %191 = arith.addf %189, %190 : vector<8x1xf32>
    %192 = math.rsqrt %191 : vector<8x1xf32>
    %193 = vector.broadcast %192 : vector<8x1xf32> to vector<8x256xf32>
    %194 = arith.mulf %184, %193 : vector<8x256xf32>
    %cst_142 = arith.constant 0.000000e+00 : f32
    %195 = vector.broadcast %cst_142 : f32 to vector<8x256xf32>
    %196 = arith.cmpf ogt, %194, %195 : vector<8x256xf32>
    %cst_143 = arith.constant 2.000000e-01 : f32
    %197 = vector.broadcast %cst_143 : f32 to vector<8x256xf32>
    %198 = arith.mulf %197, %194 : vector<8x256xf32>
    %199 = arith.select %196, %194, %198 : vector<8x256xi1>, vector<8x256xf32>
    %c1_144 = arith.constant 1 : index
    %c0_145 = arith.constant 0 : index
    %c0_146 = arith.constant 0 : index
    %200 = vector.load %arg3[%c1_144, %c0_145, %c0_146] : memref<2x8x256xf32, #tpu.memory_space<vmem>>, vector<1x8x256xf32>
    %201 = vector.shape_cast %200 : vector<1x8x256xf32> to vector<8x256xf32>
    %202 = vector.shape_cast %199 : vector<8x256xf32> to vector<1x8x256xf32>
    tpu.vector_store %arg3[%c1_144, %c0_145, %c0_146], %202 {strides = array<i32>} : memref<2x8x256xf32, #tpu.memory_space<vmem>>, vector<1x8x256xf32>,
    return
  }
  func.func @transform_0(%arg0: i32) -> (i32, i32, i32) {
    %c0_i32 = arith.constant 0 : i32
    %c0_i32_0 = arith.constant 0 : i32
    %c0_i32_1 = arith.constant 0 : i32
    %c0_i32_2 = arith.constant 0 : i32
    return %c0_i32, %c0_i32_0, %c0_i32_1 : i32, i32, i32
  }
  func.func @transform_1(%arg0: i32) -> (i32, i32, i32) {
    %c0_i32 = arith.constant 0 : i32
    %c0_i32_0 = arith.constant 0 : i32
    %c0_i32_1 = arith.constant 0 : i32
    return %arg0, %c0_i32, %c0_i32_0 : i32, i32, i32
  }
  func.func @transform_2(%arg0: i32) -> (i32, i32, i32) {
    %c0_i32 = arith.constant 0 : i32
    %c0_i32_0 = arith.constant 0 : i32
    %c0_i32_1 = arith.constant 0 : i32
    return %arg0, %c0_i32, %c0_i32_0 : i32, i32, i32
  }
}

</mosaic_0001>

<bundles_post_ra>
// kernel: tpu_custom_call.1
= control target key start
LH: loop header
LB: loop body
LE: loop exit
PB: predicated region body
PF: predicated region fallthrough
CT: control target
= control target key end

     0   :  { %s2015_s13 = smov 126   ;;  %s2351_s0 = inlined_call_operand.vmem [shape: f32[9,8,4], index: 0, kind: input, shape index: {}]   ;;  %s2352_s1 = inlined_call_operand.vmem [shape: f32[2,4,384], index: 1, kind: input, shape index: {}]   ;;  %s2353_s2 = inlined_call_operand.hbm [shape: f32[2,8,256], index: 2, kind: output, shape index: {}]  }
   0x1   :  { %v2045_v0 = vld [vmem:[%s2352_s1 + $0xc] sm:$0xff]  ;;  %v2050_v1 = vld [vmem:[%s2352_s1] sm:$0xff]  ;;  %v1891_v4 = vld [vmem:[%s2352_s1 + $0x14] sm:$0xf] }
   0x2   :  { %v2054_v2 = vcombine.high %v2045_v0, %v2045_v0  ;;  %v2058_v3 = vcombine.high %v2050_v1, %v2050_v1  ;;  %v50_v5 = vld [vmem:[%s2352_s1 + $0x8] sm:$0xf] }
   0x4   :  { %962 = vrot.lane.b32.xlu1 %v2054_v2, %s2015_s13  ;;  %56 = vrot.lane.b32.xlu0 %v2058_v3, %s2015_s13 }
   0x8   :  { %964 = vrot.lane.b32.xlu1 %v1891_v4, %s2015_s13  ;;  %58 = vrot.lane.b32.xlu0 %v50_v5, %s2015_s13 }
   0x9   :  { %7 = vsyncpa [#allocation3], 0  ;;  %v2016_v6 = vmov 0.0   ;;  %v224_v7 = vld [vmem:[%s2352_s1 + $0x8] sm:$0xf]  ;;  %s2017_s20 = smov 124   ;;  %v12_v21 = vlaneseq }
   0xa   :  { %136 = vmatprep.mubr.f32.mxu0 %v2016_v6  ;;  %1039 = vmatprep.mubr.f32.mxu1 %v2016_v6  ;;  %v1900_v8 = vld [vmem:[%s2352_s1 + $0x14] sm:$0xf]  ;;  %v326_v9 = vld [vmem:[%s2352_s1 + $0x8] sm:$0xf]  ;;  %s2018_s25 = smov 96   ;;  %s2019_s30 = smov 94  }
   0xb   :  { %v1906_v10 = vld [vmem:[%s2352_s1 + $0x14] sm:$0xf]  ;;  %v428_v11 = vld [vmem:[%s2352_s1 + $0x8] sm:$0xf]  ;;  %s2020_s7 = smov 92   ;;  %s2021_s12 = smov 64  }
   0xc   :  { %960 = vrot.lane.b32.xlu1 %v2045_v0, %s2015_s13  ;;  %54 = vrot.lane.b32.xlu0 %v2050_v1, %s2015_s13  ;;  %v1912_v12 = vld [vmem:[%s2352_s1 + $0x14] sm:$0xf]  ;;  %v524_v13 = vld [vmem:[%s2352_s1 + $0x8] sm:$0xf]  ;;  %s2022_s17 = smov 62   ;;  %s2023_s22 = smov 60  }
   0xd   :  { %v1918_v14 = vld [vmem:[%s2352_s1 + $0x14] sm:$0xf]  ;;  %v626_v15 = vld [vmem:[%s2352_s1 + $0x8] sm:$0xf]  ;;  %v13_v22 = vand.u32 127, %v12_v21  ;;  %vm60_vm0 = vcmask 1031168  }
   0xe   :  { %v1924_v16 = vld [vmem:[%s2352_s1 + $0x14] sm:$0xf]  ;;  %v728_v17 = vld [vmem:[%s2352_s1 + $0x8] sm:$0xf]  ;;  %vm67_vm1 = vcmask 1043456   ;;  %vm63_vm4 = vcmask 31744  }
   0xf   :  { %v1930_v18 = vld [vmem:[%s2352_s1 + $0x14] sm:$0xf]  ;;  %v824_v19 = vld [vmem:[%s2352_s1 + $0x8] sm:$0xf]  ;;  %v14_v23 = vadd.s32 128, %v13_v22  ;;  %v19_v27 = vand.u32 15, %v13_v22 }
  0x10   :  { %232 = vrot.lane.b32.xlu1 %v224_v7, %s2017_s20  ;;  %230 = vrot.lane.b32.xlu0 %v2058_v3, %s2017_s20  ;;  %v1936_v20 = vld [vmem:[%s2352_s1 + $0x14] sm:$0xf]  ;;  %v1855_v37 = vld [vmem:[%s2351_s0 + $0x8] sm:$0xff]  ;;  %vm234_vm5 = vcmask 1014784   ;;  %vm336_vm8 = vcmask 785408   ;;  %vm440_vm9 = vcmask 769024  }
  0x11   :  { %v26_v26 = vand.u32 15, %v14_v23  ;;  %vm2150_vm3 = vcmp.ge.s32.totalorder %v19_v27, 2  ;;  %v49_v50 = vld [vmem:[%s2351_s0] sm:$0xff]  ;;  %vm2196_vm7 = vcmp.lt.s32.totalorder %v19_v27, 14  ;;  %v1862_v62 = vld [vmem:[%s2351_s0 + $0x10] sm:$0xff]  ;;  %vm534_vm10 = vcmask 752640  }
  0x12   :  { %v47_v40 = vsel %vm2150_vm3, %v2050_v1, 0.0  ;;  %v954_v43 = vsel %vm2150_vm3, %v2045_v0, 0.0  ;;  %v1870_v21 = vld [vmem:[%s2351_s0 + $0x20] sm:$0xff]  ;;  %vm636_vm11 = vcmask 523264   ;;  %vm740_vm12 = vcmask 506880  }
  0x13   :  { %vm2144_vm2 = vcmp.ge.s32.totalorder %v26_v26, 2  ;;  %vm2170_vm6 = vcmp.lt.s32.totalorder %v26_v26, 14  ;;  %vm834_vm13 = vcmask 490496  }
  0x14   :  { %1135 = vrot.lane.b32.xlu1 %v1900_v8, %s2017_s20  ;;  %1133 = vrot.lane.b32.xlu0 %v2054_v2, %s2017_s20  ;;  %v48_v36 = vsel %vm2144_vm2, %v2058_v3, 0.0  ;;  %v955_v41 = vsel %vm2144_vm2, %v2054_v2, 0.0 }
  0x18   :  { %1131 = vrot.lane.b32.xlu1 %v2045_v0, %s2017_s20  ;;  %228 = vrot.lane.b32.xlu0 %v2050_v1, %s2017_s20 }
  0x1c   :  { %334 = vrot.lane.b32.xlu1 %v326_v9, %s2018_s25  ;;  %332 = vrot.lane.b32.xlu0 %v2058_v3, %s2018_s25 }
  0x20   :  { %1235 = vrot.lane.b32.xlu1 %v1906_v10, %s2018_s25  ;;  %1233 = vrot.lane.b32.xlu0 %v2054_v2, %s2018_s25  ;;  %v1866_v10 = vld [vmem:[%s2351_s0 + $0x18] sm:$0xff] }
  0x24   :  { %1231 = vrot.lane.b32.xlu1 %v2045_v0, %s2018_s25  ;;  %330 = vrot.lane.b32.xlu0 %v2050_v1, %s2018_s25 }
  0x28   :  { %438 = vrot.lane.b32.xlu1 %v428_v11, %s2019_s30  ;;  %436 = vrot.lane.b32.xlu0 %v2058_v3, %s2019_s30 }
  0x2c   :  { %1336 = vrot.lane.b32.xlu1 %v1912_v12, %s2019_s30  ;;  %1334 = vrot.lane.b32.xlu0 %v2054_v2, %s2019_s30 }
  0x30   :  { %1332 = vrot.lane.b32.xlu1 %v2045_v0, %s2019_s30  ;;  %434 = vrot.lane.b32.xlu0 %v2050_v1, %s2019_s30 }
  0x34   :  { %532 = vrot.lane.b32.xlu1 %v524_v13, %s2020_s7  ;;  %530 = vrot.lane.b32.xlu0 %v2058_v3, %s2020_s7 }
  0x38   :  { %1429 = vrot.lane.b32.xlu1 %v1918_v14, %s2020_s7  ;;  %1427 = vrot.lane.b32.xlu0 %v2054_v2, %s2020_s7 }
  0x3c   :  { %1425 = vrot.lane.b32.xlu1 %v2045_v0, %s2020_s7  ;;  %528 = vrot.lane.b32.xlu0 %v2050_v1, %s2020_s7 }
  0x40   :  { %634 = vrot.lane.b32.xlu1 %v626_v15, %s2021_s12  ;;  %632 = vrot.lane.b32.xlu0 %v2058_v3, %s2021_s12 }
  0x44   :  { %1529 = vrot.lane.b32.xlu1 %v1924_v16, %s2021_s12  ;;  %1527 = vrot.lane.b32.xlu0 %v2054_v2, %s2021_s12 }
  0x48   :  { %1525 = vrot.lane.b32.xlu1 %v2045_v0, %s2021_s12  ;;  %630 = vrot.lane.b32.xlu0 %v2050_v1, %s2021_s12 }
  0x4c   :  { %738 = vrot.lane.b32.xlu1 %v728_v17, %s2022_s17  ;;  %736 = vrot.lane.b32.xlu0 %v2058_v3, %s2022_s17 }
  0x50   :  { %1630 = vrot.lane.b32.xlu1 %v1930_v18, %s2022_s17  ;;  %1628 = vrot.lane.b32.xlu0 %v2054_v2, %s2022_s17 }
  0x54   :  { %1626 = vrot.lane.b32.xlu1 %v2045_v0, %s2022_s17  ;;  %734 = vrot.lane.b32.xlu0 %v2050_v1, %s2022_s17 }
  0x58   :  { %832 = vrot.lane.b32.xlu1 %v824_v19, %s2023_s22  ;;  %830 = vrot.lane.b32.xlu0 %v2058_v3, %s2023_s22 }
  0x5c   :  { %1723 = vrot.lane.b32.xlu1 %v1936_v20, %s2023_s22  ;;  %1721 = vrot.lane.b32.xlu0 %v2054_v2, %s2023_s22 }
  0x60   :  { %1719 = vrot.lane.b32.xlu1 %v2045_v0, %s2023_s22  ;;  %828 = vrot.lane.b32.xlu0 %v2050_v1, %s2023_s22 }
  0x76   :  { %v963_v24 = vpop.permute.xlu1 %962  ;;  %v57_v25 = vpop.permute.xlu0 %56 }
  0x7a   :  { %v965_v28 = vpop.permute.xlu1 %964  ;;  %v59_v29 = vpop.permute.xlu0 %58 }
  0x7b   :  { %v62_v30 = vsel %vm60_vm0, %v57_v25, %v59_v29  ;;  %v967_v31 = vsel %vm60_vm0, %v963_v24, %v965_v28 }
  0x7c   :  { %1856 = vmatprep.subr.msk.mxu0 %vm67_vm1, %v62_v30  ;;  %1893 = vmatprep.subr.msk.mxu1 %vm67_vm1, %v967_v31 }
  0x7e   :  { %v961_v34 = vpop.permute.xlu1 %960  ;;  %v55_v35 = vpop.permute.xlu0 %54 }
  0x7f   :  { %v61_v38 = vsel %vm60_vm0, %v55_v35, %v57_v25  ;;  %v966_v39 = vsel %vm60_vm0, %v961_v34, %v963_v24 }
  0x80   :  { %1857 = vmatpush1.msk.msra.mxu0 %vm67_vm1, %v61_v38  ;;  %1894 = vmatpush1.msk.msra.mxu1 %vm67_vm1, %v966_v39  ;;  %v1874_v38 = vld [vmem:[%s2351_s0 + $0x28] sm:$0xff] }
  0x81   :  { %1859 = vmatprep.subr.msk.mxu0 %vm67_vm1, %v48_v36  ;;  %1858 = vmatmul.mubr.msk.f32.vlgmr.msra.gmra.mrb[0].mxu0 %vm63_vm4, %v1855_v37 }
  0x82   :  { %v233_v44 = vpop.permute.xlu1 %232  ;;  %v231_v45 = vpop.permute.xlu0 %230  ;;  %1860 = vmatpush1.msk.msra.mxu0 %vm67_vm1, %v47_v40  ;;  %1895 = vmatmul.mubr.msk.f32.vlgmr.msra.gmra.mrb[0].mxu1 %vm63_vm4, %v1855_v37 }
  0x83   :  { %v236_v46 = vsel %vm234_vm5, %v231_v45, %v233_v44  ;;  %1896 = vmatprep.subr.msk.mxu1 %vm67_vm1, %v955_v41  ;;  %216 = vmatprep.mubr.f32.mxu0 %v2016_v6 }
  0x84   :  { %v240_v47 = vsel %vm2170_vm6, %v236_v46, 0.0  ;;  %1897 = vmatpush1.msk.msra.mxu1 %vm67_vm1, %v954_v43  ;;  %1119 = vmatprep.mubr.f32.mxu1 %v2016_v6 }
  0x85   :  { %1863 = vmatprep.subr.msk.mxu0 %vm67_vm1, %v240_v47 }
  0x86   :  { %v1136_v48 = vpop.permute.xlu1 %1135  ;;  %v1134_v49 = vpop.permute.xlu0 %1133 }
  0x87   :  { %v1138_v51 = vsel %vm234_vm5, %v1134_v49, %v1136_v48 }
  0x88   :  { %v1142_v52 = vsel %vm2170_vm6, %v1138_v51, 0.0 }
  0x89   :  { %1902 = vmatprep.subr.msk.mxu1 %vm67_vm1, %v1142_v52  ;;  %1861 = vmatmul.mubr.msk.f32.vlgmr.msra.gmra.mrb[0].mxu0 %vm63_vm4, %v49_v50 }
  0x8a   :  { %v1132_v54 = vpop.permute.xlu1 %1131  ;;  %v229_v55 = vpop.permute.xlu0 %228  ;;  %1898 = vmatmul.mubr.msk.f32.vlgmr.msra.gmra.mrb[0].mxu1 %vm63_vm4, %v49_v50  ;;  %316 = vmatprep.mubr.f32.mxu0 %v2016_v6 }
  0x8b   :  { %v1137_v56 = vsel %vm234_vm5, %v1132_v54, %v1134_v49  ;;  %v235_v57 = vsel %vm234_vm5, %v229_v55, %v231_v45  ;;  %1217 = vmatprep.mubr.f32.mxu1 %v2016_v6  ;;  %v1878_v55 = vld [vmem:[%s2351_s0 + $0x30] sm:$0xff] }
  0x8c   :  { %v1141_v58 = vsel %vm2196_vm7, %v1137_v56, 0.0  ;;  %v239_v59 = vsel %vm2196_vm7, %v235_v57, 0.0 }
  0x8d   :  { %1864 = vmatpush1.msk.msra.mxu0 %vm67_vm1, %v239_v59  ;;  %1903 = vmatpush1.msk.msra.mxu1 %vm67_vm1, %v1141_v58 }
  0x8e   :  { %v335_v60 = vpop.permute.xlu1 %334  ;;  %v333_v61 = vpop.permute.xlu0 %332 }
  0x8f   :  { %v338_v63 = vsel %vm336_vm8, %v333_v61, %v335_v60 }
  0x90   :  { %v342_v0 = vsel %vm2144_vm2, %v338_v63, 0.0 }
  0x91   :  { %1867 = vmatprep.subr.msk.mxu0 %vm67_vm1, %v342_v0  ;;  %1865 = vmatmul.mubr.msk.f32.vlgmr.msra.gmra.mrb[0].mxu0 %vm63_vm4, %v1862_v62  ;;  %v1882_v0 = vld [vmem:[%s2351_s0 + $0x38] sm:$0xff] }
  0x92   :  { %v1236_v1 = vpop.permute.xlu1 %1235  ;;  %v1234_v2 = vpop.permute.xlu0 %1233  ;;  %1904 = vmatmul.mubr.msk.f32.vlgmr.msra.gmra.mrb[0].mxu1 %vm63_vm4, %v1862_v62  ;;  %418 = vmatprep.mubr.f32.mxu0 %v2016_v6 }
  0x93   :  { %v1238_v3 = vsel %vm336_vm8, %v1234_v2, %v1236_v1  ;;  %1317 = vmatprep.mubr.f32.mxu1 %v2016_v6 }
  0x94   :  { %v1242_v4 = vsel %vm2144_vm2, %v1238_v3, 0.0 }
  0x95   :  { %1908 = vmatprep.subr.msk.mxu1 %vm67_vm1, %v1242_v4 }
  0x96   :  { %v1232_v5 = vpop.permute.xlu1 %1231  ;;  %v331_v7 = vpop.permute.xlu0 %330 }
  0x97   :  { %v1237_v8 = vsel %vm336_vm8, %v1232_v5, %v1234_v2  ;;  %v337_v9 = vsel %vm336_vm8, %v331_v7, %v333_v61 }
  0x98   :  { %v1241_v11 = vsel %vm2150_vm3, %v1237_v8, 0.0  ;;  %v341_v12 = vsel %vm2150_vm3, %v337_v9, 0.0 }
  0x99   :  { %1868 = vmatpush1.msk.msra.mxu0 %vm67_vm1, %v341_v12  ;;  %1909 = vmatpush1.msk.msra.mxu1 %vm67_vm1, %v1241_v11 }
  0x9a   :  { %v439_v13 = vpop.permute.xlu1 %438  ;;  %v437_v14 = vpop.permute.xlu0 %436  ;;  %1869 = vmatmul.mubr.msk.f32.vlgmr.msra.gmra.mrb[0].mxu0 %vm63_vm4, %v1866_v10  ;;  %1910 = vmatmul.mubr.msk.f32.vlgmr.msra.gmra.mrb[0].mxu1 %vm63_vm4, %v1866_v10 }
  0x9b   :  { %v442_v15 = vsel %vm440_vm9, %v437_v14, %v439_v13  ;;  %514 = vmatprep.mubr.f32.mxu0 %v2016_v6  ;;  %1411 = vmatprep.mubr.f32.mxu1 %v2016_v6 }
  0x9c   :  { %1871 = vmatprep.subr.msk.mxu0 %vm67_vm1, %v442_v15  ;;  %v1886_v15 = vld [vmem:[%s2351_s0 + $0x40] sm:$0xff]  ;;  %s2024_s0 = smov [#allocation2]  }
  0x9d   :  { %s1844_s14 = sshll.u32 %s2024_s0, 4  ;;  %s1845_s14 = int_to_ptr.vmem [resolvable:$true] %s1844_s14 }
  0x9e   :  { %v1337_v16 = vpop.permute.xlu1 %1336  ;;  %v1335_v17 = vpop.permute.xlu0 %1334  ;;  %s1991_s15 = scalar_lea.vmem %s1845_s14, 512  ;;  %p1996_p1 = scmp.lt.s32.totalorder %s1845_s14, %s1845_s14 }
  0x9f   :  { %v1339_v18 = vsel %vm440_vm9, %v1335_v17, %v1337_v16  ;;  %p1992_p0 = scmp.ne.s32.totalorder %s1845_s14, %s1991_s15  ;;  %p1997_p2 = scmp.lt.s32.totalorder %s1991_s15, %s1991_s15 }
  0xa0   :  { %1914 = vmatprep.subr.msk.mxu1 %vm67_vm1, %v1339_v18 }
  0xa1   :  { %p1998_p3 = por %p1997_p2, %p1996_p1 }
  0xa2   :  { %v1333_v19 = vpop.permute.xlu1 %1332  ;;  %v435_v20 = vpop.permute.xlu0 %434 }
  0xa3   :  { %v1338_v22 = vsel %vm440_vm9, %v1333_v19, %v1335_v17  ;;  %v441_v23 = vsel %vm440_vm9, %v435_v20, %v437_v14  ;;  %p1999_p4 = pnand %p1998_p3, %p1992_p0 }
  0xa4   :  { %1872 = vmatpush1.msk.msra.mxu0 %vm67_vm1, %v441_v23  ;;  %1915 = vmatpush1.msk.msra.mxu1 %vm67_vm1, %v1338_v22 }
  0xa5   :  { %1873 = vmatmul.mubr.msk.f32.vlgmr.msra.gmra.mrb[0].mxu0 %vm63_vm4, %v1870_v21  ;;  %1916 = vmatmul.mubr.msk.f32.vlgmr.msra.gmra.mrb[0].mxu1 %vm63_vm4, %v1870_v21 }
  0xa6   :  { %v533_v24 = vpop.permute.xlu1 %532  ;;  %v531_v25 = vpop.permute.xlu0 %530  ;;  %616 = vmatprep.mubr.f32.mxu0 %v2016_v6  ;;  %1511 = vmatprep.mubr.f32.mxu1 %v2016_v6 }
  0xa7   :  { %v536_v26 = vsel %vm534_vm10, %v531_v25, %v533_v24 }
  0xa8   :  { %v540_v27 = vsel %vm2170_vm6, %v536_v26, 0.0 }
  0xa9   :  { %1875 = vmatprep.subr.msk.mxu0 %vm67_vm1, %v540_v27 }
  0xaa   :  { %v1430_v28 = vpop.permute.xlu1 %1429  ;;  %v1428_v29 = vpop.permute.xlu0 %1427 }
  0xab   :  { %v1432_v30 = vsel %vm534_vm10, %v1428_v29, %v1430_v28 }
  0xac   :  { %v1436_v31 = vsel %vm2170_vm6, %v1432_v30, 0.0 }
  0xad   :  { %1920 = vmatprep.subr.msk.mxu1 %vm67_vm1, %v1436_v31 }
  0xae   :  { %v1426_v34 = vpop.permute.xlu1 %1425  ;;  %v529_v35 = vpop.permute.xlu0 %528 }
  0xaf   :  { %v1431_v36 = vsel %vm534_vm10, %v1426_v34, %v1428_v29  ;;  %v535_v37 = vsel %vm534_vm10, %v529_v35, %v531_v25 }
  0xb0   :  { %v1435_v39 = vsel %vm2196_vm7, %v1431_v36, 0.0  ;;  %v539_v40 = vsel %vm2196_vm7, %v535_v37, 0.0 }
  0xb1   :  { %1876 = vmatpush1.msk.msra.mxu0 %vm67_vm1, %v539_v40  ;;  %1921 = vmatpush1.msk.msra.mxu1 %vm67_vm1, %v1435_v39 }
  0xb2   :  { %v635_v41 = vpop.permute.xlu1 %634  ;;  %v633_v43 = vpop.permute.xlu0 %632  ;;  %1877 = vmatmul.mubr.msk.f32.vlgmr.msra.gmra.mrb[0].mxu0 %vm63_vm4, %v1874_v38  ;;  %1922 = vmatmul.mubr.msk.f32.vlgmr.msra.gmra.mrb[0].mxu1 %vm63_vm4, %v1874_v38 }
  0xb3   :  { %v638_v44 = vsel %vm636_vm11, %v633_v43, %v635_v41  ;;  %718 = vmatprep.mubr.f32.mxu0 %v2016_v6  ;;  %1611 = vmatprep.mubr.f32.mxu1 %v2016_v6 }
  0xb4   :  { %v642_v45 = vsel %vm2144_vm2, %v638_v44, 0.0 }
  0xb5   :  { %1879 = vmatprep.subr.msk.mxu0 %vm67_vm1, %v642_v45 }
  0xb6   :  { %v1530_v46 = vpop.permute.xlu1 %1529  ;;  %v1528_v47 = vpop.permute.xlu0 %1527 }
  0xb7   :  { %v1532_v48 = vsel %vm636_vm11, %v1528_v47, %v1530_v46 }
  0xb8   :  { %v1536_v49 = vsel %vm2144_vm2, %v1532_v48, 0.0 }
  0xb9   :  { %1926 = vmatprep.subr.msk.mxu1 %vm67_vm1, %v1536_v49 }
  0xba   :  { %v1526_v50 = vpop.permute.xlu1 %1525  ;;  %v631_v51 = vpop.permute.xlu0 %630 }
  0xbb   :  { %v1531_v52 = vsel %vm636_vm11, %v1526_v50, %v1528_v47  ;;  %v637_v54 = vsel %vm636_vm11, %v631_v51, %v633_v43 }
  0xbc   :  { %v1535_v56 = vsel %vm2150_vm3, %v1531_v52, 0.0  ;;  %v641_v57 = vsel %vm2150_vm3, %v637_v54, 0.0 }
  0xbd   :  { %1880 = vmatpush1.msk.msra.mxu0 %vm67_vm1, %v641_v57  ;;  %1927 = vmatpush1.msk.msra.mxu1 %vm67_vm1, %v1535_v56 }
  0xbe   :  { %v739_v32 = vpop.permute.xlu1 %738  ;;  %v737_v58 = vpop.permute.xlu0 %736  ;;  %1881 = vmatmul.mubr.msk.f32.vlgmr.msra.gmra.mrb[0].mxu0 %vm63_vm4, %v1878_v55  ;;  %1928 = vmatmul.mubr.msk.f32.vlgmr.msra.gmra.mrb[0].mxu1 %vm63_vm4, %v1878_v55 }
  0xbf   :  { %v742_v59 = vsel %vm740_vm12, %v737_v58, %v739_v32  ;;  %814 = vmatprep.mubr.f32.mxu0 %v2016_v6  ;;  %1705 = vmatprep.mubr.f32.mxu1 %v2016_v6 }
  0xc0   :  { %1883 = vmatprep.subr.msk.mxu0 %vm67_vm1, %v742_v59 }
  0xc2   :  { %v1631_v33 = vpop.permute.xlu1 %1630  ;;  %v1629_v60 = vpop.permute.xlu0 %1628 }
  0xc3   :  { %v1633_v61 = vsel %vm740_vm12, %v1629_v60, %v1631_v33 }
  0xc4   :  { %1932 = vmatprep.subr.msk.mxu1 %vm67_vm1, %v1633_v61 }
  0xc6   :  { %v1627_v62 = vpop.permute.xlu1 %1626  ;;  %v735_v63 = vpop.permute.xlu0 %734 }
  0xc7   :  { %v1632_v1 = vsel %vm740_vm12, %v1627_v62, %v1629_v60  ;;  %v741_v2 = vsel %vm740_vm12, %v735_v63, %v737_v58 }
  0xc8   :  { %1884 = vmatpush1.msk.msra.mxu0 %vm67_vm1, %v741_v2  ;;  %1933 = vmatpush1.msk.msra.mxu1 %vm67_vm1, %v1632_v1 }
  0xc9   :  { %1885 = vmatmul.mubr.msk.f32.vlgmr.msra.gmra.mrb[0].mxu0 %vm63_vm4, %v1882_v0  ;;  %1934 = vmatmul.mubr.msk.f32.vlgmr.msra.gmra.mrb[0].mxu1 %vm63_vm4, %v1882_v0 }
  0xca   :  { %v833_v3 = vpop.permute.xlu1 %832  ;;  %v831_v4 = vpop.permute.xlu0 %830  ;;  %916 = vmatprep.mubr.f32.mxu0 %v2016_v6  ;;  %1805 = vmatprep.mubr.f32.mxu1 %v2016_v6 }
  0xcb   :  { %v836_v5 = vsel %vm834_vm13, %v831_v4, %v833_v3 }
  0xcc   :  { %v840_v7 = vsel %vm2170_vm6, %v836_v5, 0.0 }
  0xcd   :  { %1887 = vmatprep.subr.msk.mxu0 %vm67_vm1, %v840_v7 }
  0xce   :  { %v1724_v8 = vpop.permute.xlu1 %1723  ;;  %v1722_v9 = vpop.permute.xlu0 %1721 }
  0xcf   :  { %v1726_v10 = vsel %vm834_vm13, %v1722_v9, %v1724_v8 }
  0xd0   :  { %v1730_v11 = vsel %vm2170_vm6, %v1726_v10, 0.0 }
  0xd1   :  { %1938 = vmatprep.subr.msk.mxu1 %vm67_vm1, %v1730_v11 }
  0xd2   :  { %v1720_v12 = vpop.permute.xlu1 %1719  ;;  %v829_v13 = vpop.permute.xlu0 %828 }
  0xd3   :  { %v1725_v6 = vsel %vm834_vm13, %v1720_v12, %v1722_v9  ;;  %v835_v14 = vsel %vm834_vm13, %v829_v13, %v831_v4 }
  0xd4   :  { %v1729_v16 = vsel %vm2196_vm7, %v1725_v6, 0.0  ;;  %v839_v17 = vsel %vm2196_vm7, %v835_v14, 0.0 }
  0xd5   :  { %1888 = vmatpush1.msk.msra.mxu0 %vm67_vm1, %v839_v17  ;;  %1939 = vmatpush1.msk.msra.mxu1 %vm67_vm1, %v1729_v16 }
  0xd6   :  { %1889 = vmatmul.mubr.msk.f32.vlgmr.msra.gmra.mrb[0].mxu0 %vm63_vm4, %v1886_v15  ;;  %1940 = vmatmul.mubr.msk.f32.vlgmr.msra.gmra.mrb[0].mxu1 %vm63_vm4, %v1886_v15 }
 0x1a9   :  { %v918_v42 = vpop.f32.mrb[0].mxu0  ;;  %v1807_v18 = vpop.f32.mrb[0].mxu1 }
 0x1aa   :  { %v920_v19 = vpop.f32.mrb[1].mxu0  ;;  %v1809_v20 = vpop.f32.mrb[1].mxu1 }
 0x1ab   :  { %v925_v21 = vadd.f32 %v920_v19, %v918_v42  ;;  %v1814_v22 = vadd.f32 %v1809_v20, %v1807_v18 }
 0x1ad   :  { %1815 = vadd.xlane.f32.xlu1 %v1814_v22  ;;  %926 = vadd.xlane.f32.xlu0 %v925_v21 }
 0x23a   :  { %v1816_v23 = vpop.xlane.xlu1 %1815  ;;  %v927_v24 = vpop.xlane.xlu0 %926 }
 0x23b   :  { %v1817_v53 = vmul.f32 0.00390625, %v1816_v23  ;;  %v928_v25 = vmul.f32 0.00390625, %v927_v24 }
 0x23d   :  { %v1818_v26 = vsub.f32 %v1807_v18, %v1817_v53  ;;  %v1819_v27 = vsub.f32 %v1809_v20, %v1817_v53  ;;  %v929_v28 = vsub.f32 %v918_v42, %v928_v25  ;;  %v930_v29 = vsub.f32 %v920_v19, %v928_v25 }
 0x23f   :  { %v931_v30 = vmul.f32 %v929_v28, %v929_v28  ;;  %v932_v31 = vmul.f32 %v930_v29, %v930_v29  ;;  %v1820_v35 = vmul.f32 %v1818_v26, %v1818_v26  ;;  %v1821_v36 = vmul.f32 %v1819_v27, %v1819_v27 }
 0x241   :  { %v933_v34 = vadd.f32 %v932_v31, %v931_v30  ;;  %v1822_v37 = vadd.f32 %v1821_v36, %v1820_v35 }
 0x243   :  { %934 = vadd.xlane.f32.xlu0 %v933_v34 }
 0x247   :  { %1823 = vadd.xlane.f32.xlu0 %v1822_v37 }
 0x2d0   :  { %v935_v38 = vpop.xlane.xlu0 %934 }
 0x2d1   :  { %v936_v39 = vmul.f32 0.00390625, %v935_v38 }
 0x2d3   :  { %v937_v40 = vadd.f32 1e-05, %v936_v39 }
 0x2d4   :  { %v1824_v41 = vpop.xlane.xlu0 %1823 }
 0x2d5   :  { %1987 = vrsqrt.f32 %v937_v40  ;;  %v1825_v43 = vmul.f32 0.00390625, %v1824_v41 }
 0x2d7   :  { %v1826_v44 = vadd.f32 1e-05, %v1825_v43 }
 0x2d9   :  { %1989 = vrsqrt.f32 %v1826_v44 }
 0x2df   :  { %v1988_v45 = vpop.eup %1987 }
 0x2e0   :  { %v939_v46 = vmul.f32 %v1988_v45, %v929_v28  ;;  %v940_v47 = vmul.f32 %v1988_v45, %v930_v29 }
 0x2e2   :  { %vm941_vm14 = vcmp.gt.f32.partialorder %v939_v46, 0.0  ;;  %vm942_vm15 = vcmp.gt.f32.partialorder %v940_v47, 0.0  ;;  %v943_v48 = vmul.f32 0.2, %v939_v46  ;;  %v944_v49 = vmul.f32 0.2, %v940_v47 }
 0x2e3   :  { %v1990_v50 = vpop.eup %1989 }
 0x2e4   :  { %v1828_v51 = vmul.f32 %v1990_v50, %v1818_v26  ;;  %v1829_v52 = vmul.f32 %v1990_v50, %v1819_v27  ;;  %v945_v54 = vsel %vm941_vm14, %v939_v46, %v943_v48  ;;  %v946_v55 = vsel %vm942_vm15, %v940_v47, %v944_v49 }
 0x2e5   :  { %947 = vst [vmem:[#allocation2] sm:$0xff] %v945_v54  ;;  %948 = vst [vmem:[#allocation2 + $0x8] sm:$0xff] %v946_v55 }
 0x2e6   :  { %vm1830_vm0 = vcmp.gt.f32.partialorder %v1828_v51, 0.0  ;;  %vm1831_vm1 = vcmp.gt.f32.partialorder %v1829_v52, 0.0  ;;  %v1832_v56 = vmul.f32 0.2, %v1828_v51  ;;  %v1833_v57 = vmul.f32 0.2, %v1829_v52 }
 0x2e8   :  { %v1834_v32 = vsel %vm1830_vm0, %v1828_v51, %v1832_v56  ;;  %v1835_v58 = vsel %vm1831_vm1, %v1829_v52, %v1833_v57 }
 0x2e9   :  { %1837 = vst [vmem:[#allocation2 + $0x10] sm:$0xff] %v1834_v32  ;;  %1838 = vst [vmem:[#allocation2 + $0x18] sm:$0xff] %v1835_v58 }
 0x2ea   :  { %2002 = shalt.err (!%p1999_p4)
}
 0x2eb   :  { %s2003_s18 = scalar_lea.hbm %s2353_s2, 512 }
 0x2ec   :  { %p2004_p5 = scmp.ne.s32.totalorder %s2353_s2, %s2003_s18  ;;  %p2007_p6 = scmp.lt.u32.totalorder %s2003_s18, %s2353_s2 }
 0x2ee   :  { %p2009_p7 = pnand %p2007_p6, %p2004_p5 }
 0x2f0   :  { %2012 = shalt.err (!%p2009_p7)
}
 0x2f1   :  { %s2025_s23 = smov 256   ;;  %s2026_s24 = smov 16  }
 0x2f2   :  { %1850 = dma.vmem_to_hbm [thread:$0]  %s1845_s14, 512, %s2353_s2, [#allocation3], %s2025_s23, %s2025_s23, %s2026_s24  }
 0x2f3   :  { %2013 = dma.done.wait [#allocation3], 512  }
 0x2f4   :  { %2014 = vsyncadd [#allocation3], 4294966784 }
 0x2f5   :  { %1854 = vsyncpa [#allocation3], 1 }

</bundles_post_ra>
